<compile_context>
chip_gen: v6e
topology: v6e:2x2x1
jax: 0.10.0
libtpu: 0.0.40
codegen_flags: <defaults>
</compile_context>

<pallas_src>
import math

import jax
import jax.numpy as jnp
from jax.experimental import pallas as pl
from jax.experimental.pallas import tpu as pltpu


IN_DIM = 100            # logical feature width of the PyTorch module
OUT_PAD = 128           # lane-dense padded output width (cols 100..127 == 0)
HID1, HID2 = 256, 512   # hidden widths


def _round_up(x, m):
    return ((x + m - 1) // m) * m


def _generator_kernel(z_ref,
                      w1_ref, b1_ref,
                      w2_ref, b2_ref,
                      w3_ref, b3_ref,
                      w4_ref, b4_ref,
                      out_ref):
    # One batch tile per grid step; fully fused 4-layer MLP.
    # bf16 MXU operands, f32 accumulation, f32 bias add, bf16 re-cast between
    # layers; final tanh in f32, stored as bf16.
    z = z_ref[...].astype(jnp.bfloat16)          # in-kernel f32 -> bf16 cast

    h = jnp.dot(z, w1_ref[...],                   # K=100: Mosaic pads contraction
                preferred_element_type=jnp.float32) + b1_ref[...]
    h = jnp.maximum(h, 0.0).astype(jnp.bfloat16)

    h = jnp.dot(h, w2_ref[...],
                preferred_element_type=jnp.float32) + b2_ref[...]
    h = jnp.maximum(h, 0.0).astype(jnp.bfloat16)

    h = jnp.dot(h, w3_ref[...],
                preferred_element_type=jnp.float32) + b3_ref[...]
    h = jnp.maximum(h, 0.0).astype(jnp.bfloat16)

    h = jnp.dot(h, w4_ref[...],
                preferred_element_type=jnp.float32) + b4_ref[...]
    out_ref[...] = jnp.tanh(h).astype(jnp.bfloat16)   # bf16 lane-dense store


def _resident_spec(shape):
    """Full-block, constant-index weight/bias spec (VMEM-resident across the
    whole batch grid).  Single-buffered when the installed JAX supports it."""
    kwargs = {}
    if hasattr(pl, "Buffered"):
        kwargs["pipeline_mode"] = pl.Buffered(1)
    return pl.BlockSpec(shape, lambda i: (0, 0), **kwargs)


def _choose_tile(B, tb):
    if B <= 256:
        # Single tile; round to 16 so bf16 tiles stay sublane-packed (16,128).
        return _round_up(B, 16)
    # At least 2 grid steps (v7x has 2 TensorCores on the "parallel" axis),
    # tiles of >= 256 rows, capped at `tb` rows to bound per-step VMEM.
    half = _round_up(-(-B // 2), 16)
    return min(tb, max(256, half))


def generator_forward(z, params, *, tb=1024):
    """z: [B, 100] float32.  Returns [B, 100] bfloat16 (tanh output).

    `params` holds bf16 weights ([in, out], layer-4 cols padded to 128 with
    zeros) and f32 biases ([1, out]) as produced by pack_params().
    """
    B, F = z.shape
    assert F == IN_DIM

    TB = _choose_tile(B, tb)
    B_pad = _round_up(B, TB)

    # Pad batch only when needed (no feature pad, no dtype cast in the wrapper).
    if B_pad != B:
        z_in = jnp.zeros((B_pad, IN_DIM), z.dtype).at[:B].set(z)
    else:
        z_in = z

    w1, b1 = params["w1"], params["b1"]
    w2, b2 = params["w2"], params["b2"]
    w3, b3 = params["w3"], params["b3"]
    w4, b4 = params["w4"], params["b4"]

    grid = (B_pad // TB,)

    out_p = pl.pallas_call(
        _generator_kernel,
        out_shape=jax.ShapeDtypeStruct((B_pad, OUT_PAD), jnp.bfloat16),
        grid=grid,
        in_specs=[
            pl.BlockSpec((TB, IN_DIM), lambda i: (i, 0)),   # z tile (f32, K=100)
            _resident_spec(w1.shape), _resident_spec(b1.shape),
            _resident_spec(w2.shape), _resident_spec(b2.shape),
            _resident_spec(w3.shape), _resident_spec(b3.shape),
            _resident_spec(w4.shape), _resident_spec(b4.shape),
        ],
        out_specs=pl.BlockSpec((TB, OUT_PAD), lambda i: (i, 0)),
        compiler_params=pltpu.CompilerParams(
            dimension_semantics=("parallel",)),
    )(z_in, w1, b1, w2, b2, w3, b3, w4, b4)

    # Only the padded rows/lanes are dropped here; the kernel store itself is
    # lane-dense.  (Downstream consumers could fuse this slice away.)
    return out_p[:B, :IN_DIM]


def init_fp32_params(key):
    """f32 params mimicking PyTorch nn.Linear default init
    (U(-1/sqrt(fan_in), 1/sqrt(fan_in)) for weight and bias)."""
    dims = [(IN_DIM, HID1), (HID1, HID2), (HID2, HID1), (HID1, IN_DIM)]
    params = {}
    for i, (fan_in, fan_out) in enumerate(dims, start=1):
        key, kw, kb = jax.random.split(key, 3)
        bound = 1.0 / math.sqrt(fan_in)
        params[f"w{i}"] = jax.random.uniform(
            kw, (fan_in, fan_out), jnp.float32, -bound, bound)
        params[f"b{i}"] = jax.random.uniform(
            kb, (fan_out,), jnp.float32, -bound, bound)
    return params


def pack_params(p32):
    """Kernel layout: bf16 [in, out] weights, f32 [1, out] biases; the final
    layer's output dim is zero-padded 100 -> 128 (padded lanes stay exactly 0
    through bias add and tanh, so they cannot leak into real outputs)."""
    packed = {}
    for i in range(1, 5):
        w = p32[f"w{i}"]
        b = p32[f"b{i}"]
        fan_in, fan_out = w.shape
        if fan_out == IN_DIM:                       # last layer: pad N to 128
            w_p = jnp.zeros((fan_in, OUT_PAD), jnp.float32).at[:, :fan_out].set(w)
            b_p = jnp.zeros((1, OUT_PAD), jnp.float32).at[:, :fan_out].set(b)
        else:
            w_p = w
            b_p = b.reshape(1, fan_out)
        packed[f"w{i}"] = w_p.astype(jnp.bfloat16)
        packed[f"b{i}"] = b_p                       # biases stay f32
    return packed


def _reference_forward_f32(z, p32):
    """Pure-f32 reference matching the PyTorch Generator."""
    h = jnp.maximum(z @ p32["w1"] + p32["b1"], 0.0)
    h = jnp.maximum(h @ p32["w2"] + p32["b2"], 0.0)
    h = jnp.maximum(h @ p32["w3"] + p32["b3"], 0.0)
    return jnp.tanh(h @ p32["w4"] + p32["b4"])


if __name__ == "__main__":
    key = jax.random.PRNGKey(0)
    key, kz = jax.random.split(key)

    B = 8  # small batch for the self-check
    z = jax.random.normal(kz, (B, IN_DIM), dtype=jnp.float32)

    p32 = init_fp32_params(key)
    params = pack_params(p32)

    out = generator_forward(z, params)
    out = jax.block_until_ready(out)

    ref = _reference_forward_f32(z, p32)
    assert out.shape == (B, IN_DIM)
    err = float(jnp.max(jnp.abs(out.astype(jnp.float32) - ref)))
    # bf16 operands / activations vs. pure-f32 reference: tolerance ~1e-2..3e-2.
    assert err < 3e-2, err

    print("KERNEL_OK")
</pallas_src>

<mosaic_0001>
module attributes {stable_mosaic.version = 11 : i64} {
  func.func @_generator_kernel(%arg0: i32, %arg1: memref<16x100xf32, #tpu.memory_space<vmem>>, %arg2: memref<100x256xbf16, #tpu.memory_space<vmem>>, %arg3: memref<1x256xf32, #tpu.memory_space<vmem>>, %arg4: memref<256x512xbf16, #tpu.memory_space<vmem>>, %arg5: memref<1x512xf32, #tpu.memory_space<vmem>>, %arg6: memref<512x256xbf16, #tpu.memory_space<vmem>>, %arg7: memref<1x256xf32, #tpu.memory_space<vmem>>, %arg8: memref<256x128xbf16, #tpu.memory_space<vmem>>, %arg9: memref<1x128xf32, #tpu.memory_space<vmem>>, %arg10: memref<16x128xbf16, #tpu.memory_space<vmem>>) attributes {dimension_semantics = [#tpu.dimension_semantics<parallel>], iteration_bounds = array<i64: 1>, scalar_prefetch = 0 : i64, scratch_operands = 0 : i64, tpu.core_type = #tpu.core_type<tc>, window_params = [{transform_indices = @transform_0, window_bounds = array<i64: 16, 100>}, {pipeline_mode = #tpu.pipeline_mode<synchronous>, transform_indices = @transform_1, window_bounds = array<i64: 100, 256>}, {pipeline_mode = #tpu.pipeline_mode<synchronous>, transform_indices = @transform_2, window_bounds = array<i64: 1, 256>}, {pipeline_mode = #tpu.pipeline_mode<synchronous>, transform_indices = @transform_3, window_bounds = array<i64: 256, 512>}, {pipeline_mode = #tpu.pipeline_mode<synchronous>, transform_indices = @transform_4, window_bounds = array<i64: 1, 512>}, {pipeline_mode = #tpu.pipeline_mode<synchronous>, transform_indices = @transform_5, window_bounds = array<i64: 512, 256>}, {pipeline_mode = #tpu.pipeline_mode<synchronous>, transform_indices = @transform_6, window_bounds = array<i64: 1, 256>}, {pipeline_mode = #tpu.pipeline_mode<synchronous>, transform_indices = @transform_7, window_bounds = array<i64: 256, 128>}, {pipeline_mode = #tpu.pipeline_mode<synchronous>, transform_indices = @transform_8, window_bounds = array<i64: 1, 128>}, {transform_indices = @transform_9, window_bounds = array<i64: 16, 128>}]} {
    %c0 = arith.constant 0 : index
    %c0_0 = arith.constant 0 : index
    %0 = vector.load %arg1[%c0, %c0_0] : memref<16x100xf32, #tpu.memory_space<vmem>>, vector<16x100xf32>
    %1 = arith.truncf %0 : vector<16x100xf32> to vector<16x100xbf16>
    %c0_1 = arith.constant 0 : index
    %c0_2 = arith.constant 0 : index
    %2 = vector.load %arg2[%c0_1, %c0_2] : memref<100x256xbf16, #tpu.memory_space<vmem>>, vector<100x256xbf16>
    %cst = arith.constant dense<0.000000e+00> : vector<16x256xf32>
    %3 = tpu.matmul %1, %2, %cst {dimension_numbers = #tpu.dot_dimension_numbers<[1], [0], [0], [1], [0, 0, 1, 1], [], []>} : vector<16x100xbf16>, vector<100x256xbf16>, vector<16x256xf32> -> vector<16x256xf32>
    %c0_3 = arith.constant 0 : index
    %c0_4 = arith.constant 0 : index
    %4 = vector.load %arg3[%c0_3, %c0_4] : memref<1x256xf32, #tpu.memory_space<vmem>>, vector<1x256xf32>
    %5 = vector.broadcast %4 : vector<1x256xf32> to vector<16x256xf32>
    %6 = arith.addf %3, %5 : vector<16x256xf32>
    %cst_5 = arith.constant 0.000000e+00 : f32
    %7 = vector.broadcast %cst_5 : f32 to vector<16x256xf32>
    %8 = arith.maximumf %6, %7 : vector<16x256xf32>
    %9 = arith.truncf %8 : vector<16x256xf32> to vector<16x256xbf16>
    %c0_6 = arith.constant 0 : index
    %c0_7 = arith.constant 0 : index
    %10 = vector.load %arg4[%c0_6, %c0_7] : memref<256x512xbf16, #tpu.memory_space<vmem>>, vector<256x512xbf16>
    %cst_8 = arith.constant dense<0.000000e+00> : vector<16x512xf32>
    %11 = tpu.matmul %9, %10, %cst_8 {dimension_numbers = #tpu.dot_dimension_numbers<[1], [0], [0], [1], [0, 0, 1, 1], [], []>} : vector<16x256xbf16>, vector<256x512xbf16>, vector<16x512xf32> -> vector<16x512xf32>
    %c0_9 = arith.constant 0 : index
    %c0_10 = arith.constant 0 : index
    %12 = vector.load %arg5[%c0_9, %c0_10] : memref<1x512xf32, #tpu.memory_space<vmem>>, vector<1x512xf32>
    %13 = vector.broadcast %12 : vector<1x512xf32> to vector<16x512xf32>
    %14 = arith.addf %11, %13 : vector<16x512xf32>
    %cst_11 = arith.constant 0.000000e+00 : f32
    %15 = vector.broadcast %cst_11 : f32 to vector<16x512xf32>
    %16 = arith.maximumf %14, %15 : vector<16x512xf32>
    %17 = arith.truncf %16 : vector<16x512xf32> to vector<16x512xbf16>
    %c0_12 = arith.constant 0 : index
    %c0_13 = arith.constant 0 : index
    %18 = vector.load %arg6[%c0_12, %c0_13] : memref<512x256xbf16, #tpu.memory_space<vmem>>, vector<512x256xbf16>
    %cst_14 = arith.constant dense<0.000000e+00> : vector<16x256xf32>
    %19 = tpu.matmul %17, %18, %cst_14 {dimension_numbers = #tpu.dot_dimension_numbers<[1], [0], [0], [1], [0, 0, 1, 1], [], []>} : vector<16x512xbf16>, vector<512x256xbf16>, vector<16x256xf32> -> vector<16x256xf32>
    %c0_15 = arith.constant 0 : index
    %c0_16 = arith.constant 0 : index
    %20 = vector.load %arg7[%c0_15, %c0_16] : memref<1x256xf32, #tpu.memory_space<vmem>>, vector<1x256xf32>
    %21 = vector.broadcast %20 : vector<1x256xf32> to vector<16x256xf32>
    %22 = arith.addf %19, %21 : vector<16x256xf32>
    %cst_17 = arith.constant 0.000000e+00 : f32
    %23 = vector.broadcast %cst_17 : f32 to vector<16x256xf32>
    %24 = arith.maximumf %22, %23 : vector<16x256xf32>
    %25 = arith.truncf %24 : vector<16x256xf32> to vector<16x256xbf16>
    %c0_18 = arith.constant 0 : index
    %c0_19 = arith.constant 0 : index
    %26 = vector.load %arg8[%c0_18, %c0_19] : memref<256x128xbf16, #tpu.memory_space<vmem>>, vector<256x128xbf16>
    %cst_20 = arith.constant dense<0.000000e+00> : vector<16x128xf32>
    %27 = tpu.matmul %25, %26, %cst_20 {dimension_numbers = #tpu.dot_dimension_numbers<[1], [0], [0], [1], [0, 0, 1, 1], [], []>} : vector<16x256xbf16>, vector<256x128xbf16>, vector<16x128xf32> -> vector<16x128xf32>
    %c0_21 = arith.constant 0 : index
    %c0_22 = arith.constant 0 : index
    %28 = vector.load %arg9[%c0_21, %c0_22] : memref<1x128xf32, #tpu.memory_space<vmem>>, vector<1x128xf32>
    %29 = vector.broadcast %28 : vector<1x128xf32> to vector<16x128xf32>
    %30 = arith.addf %27, %29 : vector<16x128xf32>
    %31 = math.tanh %30 : vector<16x128xf32>
    %32 = arith.truncf %31 : vector<16x128xf32> to vector<16x128xbf16>
    %c0_23 = arith.constant 0 : index
    %c0_24 = arith.constant 0 : index
    %33 = vector.load %arg10[%c0_23, %c0_24] : memref<16x128xbf16, #tpu.memory_space<vmem>>, vector<16x128xbf16>
    tpu.vector_store %arg10[%c0_23, %c0_24], %32 {strides = array<i32>} : memref<16x128xbf16, #tpu.memory_space<vmem>>, vector<16x128xbf16>,
    return
  }
  func.func @transform_0(%arg0: i32) -> (i32, i32) {
    %c0_i32 = arith.constant 0 : i32
    %c0_i32_0 = arith.constant 0 : i32
    return %arg0, %c0_i32 : i32, i32
  }
  func.func @transform_1(%arg0: i32) -> (i32, i32) {
    %c0_i32 = arith.constant 0 : i32
    %c0_i32_0 = arith.constant 0 : i32
    %c0_i32_1 = arith.constant 0 : i32
    return %c0_i32, %c0_i32_0 : i32, i32
  }
  func.func @transform_2(%arg0: i32) -> (i32, i32) {
    %c0_i32 = arith.constant 0 : i32
    %c0_i32_0 = arith.constant 0 : i32
    %c0_i32_1 = arith.constant 0 : i32
    return %c0_i32, %c0_i32_0 : i32, i32
  }
  func.func @transform_3(%arg0: i32) -> (i32, i32) {
    %c0_i32 = arith.constant 0 : i32
    %c0_i32_0 = arith.constant 0 : i32
    %c0_i32_1 = arith.constant 0 : i32
    return %c0_i32, %c0_i32_0 : i32, i32
  }
  func.func @transform_4(%arg0: i32) -> (i32, i32) {
    %c0_i32 = arith.constant 0 : i32
    %c0_i32_0 = arith.constant 0 : i32
    %c0_i32_1 = arith.constant 0 : i32
    return %c0_i32, %c0_i32_0 : i32, i32
  }
  func.func @transform_5(%arg0: i32) -> (i32, i32) {
    %c0_i32 = arith.constant 0 : i32
    %c0_i32_0 = arith.constant 0 : i32
    %c0_i32_1 = arith.constant 0 : i32
    return %c0_i32, %c0_i32_0 : i32, i32
  }
  func.func @transform_6(%arg0: i32) -> (i32, i32) {
    %c0_i32 = arith.constant 0 : i32
    %c0_i32_0 = arith.constant 0 : i32
    %c0_i32_1 = arith.constant 0 : i32
    return %c0_i32, %c0_i32_0 : i32, i32
  }
  func.func @transform_7(%arg0: i32) -> (i32, i32) {
    %c0_i32 = arith.constant 0 : i32
    %c0_i32_0 = arith.constant 0 : i32
    %c0_i32_1 = arith.constant 0 : i32
    return %c0_i32, %c0_i32_0 : i32, i32
  }
  func.func @transform_8(%arg0: i32) -> (i32, i32) {
    %c0_i32 = arith.constant 0 : i32
    %c0_i32_0 = arith.constant 0 : i32
    %c0_i32_1 = arith.constant 0 : i32
    return %c0_i32, %c0_i32_0 : i32, i32
  }
  func.func @transform_9(%arg0: i32) -> (i32, i32) {
    %c0_i32 = arith.constant 0 : i32
    %c0_i32_0 = arith.constant 0 : i32
    return %arg0, %c0_i32 : i32, i32
  }
}

</mosaic_0001>

<bundles_post_ra>
// kernel: tpu_custom_call.1
= control target key start
LH: loop header
LB: loop body
LE: loop exit
PB: predicated region body
PF: predicated region fallthrough
CT: control target
= control target key end

     0   :  { %14 = vsyncpa [#allocation3], 0  ;;  %s2134_s0 = inlined_call_operand.hbm [shape: f32[16,100], index: 0, kind: input, shape index: {}]   ;;  %s2135_s1 = inlined_call_operand.hbm [shape: bf16[100,256], index: 1, kind: input, shape index: {}]   ;;  %s2136_s2 = inlined_call_operand.vmem [shape: f32[1,256], index: 2, kind: input, shape index: {}]   ;;  %s2137_s3 = inlined_call_operand.hbm [shape: bf16[256,512], index: 3, kind: input, shape index: {}]   ;;  %s2138_s4 = inlined_call_operand.vmem [shape: f32[1,512], index: 4, kind: input, shape index: {}]   ;;  %s2139_s5 = inlined_call_operand.hbm [shape: bf16[512,256], index: 5, kind: input, shape index: {}]   ;;  %s2140_s6 = inlined_call_operand.vmem [shape: f32[1,256], index: 6, kind: input, shape index: {}]   ;;  %s2141_s7 = inlined_call_operand.hbm [shape: bf16[256,128], index: 7, kind: input, shape index: {}]   ;;  %s2142_s8 = inlined_call_operand.vmem [shape: f32[1,128], index: 8, kind: input, shape index: {}]   ;;  %s2143_s9 = inlined_call_operand.hbm [shape: bf16[16,128], index: 9, kind: output, shape index: {}]  }
   0x1   :  { %15 = vsyncpa [#allocation6], 0 }
   0x2   :  { %16 = vsyncpa [#allocation9], 0 }
   0x3   :  { %17 = vsyncpa [#allocation4], 0  ;;  %s2019_s30 = smov [#allocation5]   ;;  %s2020_s11 = smov [#allocation8]  }
   0x4   :  { %s35_s10 = sshll.u32 %s2019_s30, 4  ;;  %s63_s12 = sshll.u32 %s2020_s11, 4  ;;  %s36_s10 = int_to_ptr.vmem [resolvable:$true] %s35_s10  ;;  %s64_s12 = int_to_ptr.vmem [resolvable:$true] %s63_s12 }
   0x5   :  { %s1899_s13 = scalar_lea.vmem %s36_s10, 1664  ;;  %p1904_p1 = scmp.lt.s32.totalorder %s36_s10, %s36_s10 }
   0x6   :  { %p1900_p0 = scmp.ne.s32.totalorder %s36_s10, %s1899_s13  ;;  %p1905_p2 = scmp.lt.s32.totalorder %s1899_s13, %s1899_s13 }
   0x8   :  { %p1906_p3 = por %p1905_p2, %p1904_p1 }
   0xa   :  { %p1907_p4 = pnand %p1906_p3, %p1900_p0 }
   0xc   :  { %1910 = shalt.err (!%p1907_p4)
}
   0xd   :  { %s2021_s14 = smov 128   ;;  %s2022_s15 = smov 8  }
   0xe   :  { %41 = dma.hbm_to_vmem [thread:$0]  %s2135_s1, 1664, %s36_s10, [#allocation6], %s2021_s14, %s2021_s14, %s2022_s15  }
   0xf   :  { %s1919_s18 = scalar_lea.vmem %s64_s12, 8192  ;;  %p1924_p6 = scmp.lt.s32.totalorder %s64_s12, %s64_s12 }
  0x10   :  { %p1920_p5 = scmp.ne.s32.totalorder %s64_s12, %s1919_s18  ;;  %p1925_p7 = scmp.lt.s32.totalorder %s1919_s18, %s1919_s18 }
  0x12   :  { %p1926_p8 = por %p1925_p7, %p1924_p6 }
  0x14   :  { %p1927_p9 = pnand %p1926_p8, %p1920_p5 }
  0x16   :  { %1930 = shalt.err (!%p1927_p9)
}
  0x17   :  { %69 = dma.hbm_to_vmem [thread:$0]  %s2139_s5, 8192, %s64_s12, [#allocation9], %s2021_s14, %s2021_s14, %s2022_s15  }
  0x18   :  { %s2023_s21 = smov [#allocation2]   ;;  %s2024_s23 = smov [#allocation7]  }
  0x19   :  { %s23_s22 = sshll.u32 %s2023_s21, 4  ;;  %s49_s24 = sshll.u32 %s2024_s23, 4  ;;  %s24_s22 = int_to_ptr.vmem [resolvable:$true] %s23_s22  ;;  %s50_s24 = int_to_ptr.vmem [resolvable:$true] %s49_s24 }
  0x1a   :  { %s1939_s25 = scalar_lea.vmem %s24_s22, 256  ;;  %p1944_p11 = scmp.lt.s32.totalorder %s24_s22, %s24_s22 }
  0x1b   :  { %p1940_p10 = scmp.ne.s32.totalorder %s24_s22, %s1939_s25  ;;  %p1945_p12 = scmp.lt.s32.totalorder %s1939_s25, %s1939_s25 }
  0x1d   :  { %p1946_p13 = por %p1945_p12, %p1944_p11 }
  0x1f   :  { %p1947_p0 = pnand %p1946_p13, %p1940_p10 }
  0x21   :  { %1950 = shalt.err (!%p1947_p0)
}
  0x22   :  { %29 = dma.hbm_to_vmem [thread:$0]  %s2134_s0, 256, %s24_s22, [#allocation3], %s2021_s14, %s2021_s14, %s2022_s15  }
  0x23   :  { %s1959_s27 = scalar_lea.vmem %s50_s24, 8192  ;;  %p1964_p2 = scmp.lt.s32.totalorder %s50_s24, %s50_s24 }
  0x24   :  { %p1960_p1 = scmp.ne.s32.totalorder %s50_s24, %s1959_s27  ;;  %p1965_p3 = scmp.lt.s32.totalorder %s1959_s27, %s1959_s27 }
  0x26   :  { %p1966_p4 = por %p1965_p3, %p1964_p2 }
  0x28   :  { %p1967_p5 = pnand %p1966_p4, %p1960_p1 }
  0x2a   :  { %1970 = shalt.err (!%p1967_p5)
}
  0x2b   :  { %s2025_s5 = smov 256   ;;  %s2026_s28 = smov 16  }
  0x2c   :  { %55 = dma.hbm_to_vmem [thread:$0]  %s2137_s3, 8192, %s50_s24, [#allocation6], %s2025_s5, %s2025_s5, %s2026_s28  }
  0x2d   :  { %s2027_s10 = smov [#allocation10]  }
  0x2e   :  { %s77_s11 = sshll.u32 %s2027_s10, 4  ;;  %s78_s11 = int_to_ptr.vmem [resolvable:$true] %s77_s11 }
  0x2f   :  { %s1979_s12 = scalar_lea.vmem %s78_s11, 2048  ;;  %p1984_p7 = scmp.lt.s32.totalorder %s78_s11, %s78_s11 }
  0x30   :  { %p1980_p6 = scmp.ne.s32.totalorder %s78_s11, %s1979_s12  ;;  %p1985_p8 = scmp.lt.s32.totalorder %s1979_s12, %s1979_s12 }
  0x32   :  { %p1986_p9 = por %p1985_p8, %p1984_p7 }
  0x34   :  { %p1987_p10 = pnand %p1986_p9, %p1980_p6 }
  0x36   :  { %1990 = shalt.err (!%p1987_p10)
}
  0x37   :  { %s2028_s0 = smov 64   ;;  %s2029_s13 = smov 4  }
  0x38   :  { %83 = dma.hbm_to_vmem [thread:$0]  %s2141_s7, 2048, %s78_s11, [#allocation9], %s2028_s0, %s2028_s0, %s2029_s13  }
  0x39   :  { %2011 = dma.done.wait [#allocation3], 256  }
  0x3a   :  { %2012 = vsyncadd [#allocation3], 4294967040 }
  0x3b   :  { %2013 = dma.done.wait [#allocation6], 9856  }
  0x3c   :  { %2014 = vsyncadd [#allocation6], 4294957440 }
  0x3d   :  { %2015 = dma.done.wait [#allocation9], 10240  }
  0x3e   :  { %2016 = vsyncadd [#allocation9], 4294957056  ;;  %v2030_v0 = vmov 0   ;;  %v117_v1 = vld [vmem:[#allocation5 + $0x60] sm:$0x33]  ;;  %vm199_vm0 = vcmask 1041408  }
  0x3f   :  { %238 = vmatprep.mubr.bf16.mxu0 %v2030_v0  ;;  %v1467_v2 = vcombine.high %v117_v1, %v117_v1  ;;  %v1466_v3 = vcombine.low %v117_v1, %v117_v1  ;;  %v1661_v4 = vld [vmem:[#allocation5 + $0x54] ss:$8 sps:$4 sm:$0xff]   ;;  %v1663_v6 = vld [vmem:[#allocation5 + $0x50] ss:$8 sps:$4 sm:$0xff]   ;;  %v1664_v7 = vld [vmem:[#allocation5 + $0x44] ss:$8 sps:$4 sm:$0xff]  }
  0x40   :  { %v1666_v8 = vld [vmem:[#allocation5 + $0x40] ss:$8 sps:$4 sm:$0xff]   ;;  %v1667_v9 = vld [vmem:[#allocation5 + $0x34] ss:$8 sps:$4 sm:$0xff]   ;;  %v1669_v11 = vld [vmem:[#allocation5 + $0x30] ss:$8 sps:$4 sm:$0xff]  }
  0x41   :  { %1468 = vmatprep.subr.msk.bf16.mxu0 %vm199_vm0, %v1467_v2  ;;  %v201_v5 = vsel %vm199_vm0, %v1466_v3, 0  ;;  %v1679_v10 = vld [vmem:[#allocation7 + $0xe4] ss:$16 sps:$4 sm:$0xff]   ;;  %v1684_v12 = vld [vmem:[#allocation7 + $0xe0] ss:$16 sps:$4 sm:$0xff]   ;;  %v102_v26 = vld [vmem:[#allocation2] sm:$0xff] }
  0x42   :  { %209 = vmatpush1.bf16.msra.mxu0 %v201_v5  ;;  %661 = vmatprep.subr.bf16.mxu1 %v1679_v10  ;;  %v1685_v13 = vld [vmem:[#allocation7 + $0xc4] ss:$16 sps:$4 sm:$0xff]   ;;  %v1690_v15 = vld [vmem:[#allocation7 + $0xc0] ss:$16 sps:$4 sm:$0xff]   ;;  %v1683_v28 = vld [vmem:[#allocation7 + $0xec] ss:$16 sps:$4 sm:$0xff]  }
  0x43   :  { %210 = vmatprep.subr.bf16.mxu0 %v1661_v4  ;;  %v1670_v14 = vld [vmem:[#allocation5 + $0x24] ss:$8 sps:$4 sm:$0xff]   ;;  %662 = vmatpush1.bf16.msra.mxu1 %v1684_v12  ;;  %v1672_v17 = vld [vmem:[#allocation5 + $0x20] ss:$8 sps:$4 sm:$0xff]   ;;  %v1673_v18 = vld [vmem:[#allocation5 + $0x14] ss:$8 sps:$4 sm:$0xff]  }
  0x44   :  { %663 = vmatprep.subr.bf16.mxu1 %v1685_v13  ;;  %v1691_v16 = vld [vmem:[#allocation7 + $0xa4] ss:$16 sps:$4 sm:$0xff]   ;;  %v1696_v19 = vld [vmem:[#allocation7 + $0xa0] ss:$16 sps:$4 sm:$0xff]   ;;  %vm195_vm1 = vcmask 818176   ;;  %s2031_s19 = smov [#allocation11]  }
  0x45   :  { %v1697_v20 = vld [vmem:[#allocation7 + $0x84] ss:$16 sps:$4 sm:$0xff]   ;;  %v1675_v21 = vld [vmem:[#allocation5 + $0x10] ss:$8 sps:$4 sm:$0xff]   ;;  %v1678_v25 = vld [vmem:[#allocation5] ss:$8 sps:$4 sm:$0xff]  }
  0x46   :  { %211 = vmatpush1.bf16.msra.mxu0 %v1663_v6  ;;  %v1676_v22 = vld [vmem:[#allocation5 + $0x4] ss:$8 sps:$4 sm:$0xff]   ;;  %v1702_v23 = vld [vmem:[#allocation7 + $0x80] ss:$16 sps:$4 sm:$0xff]   ;;  %v1681_v32 = vld [vmem:[#allocation7 + $0xe8] ss:$16 sps:$4 sm:$0xff]  }
  0x47   :  { %212 = vmatprep.subr.bf16.mxu0 %v1664_v7  ;;  %664 = vmatpush1.bf16.msra.mxu1 %v1690_v15  ;;  %v1703_v24 = vld [vmem:[#allocation7 + $0x64] ss:$16 sps:$4 sm:$0xff]   ;;  %v1708_v29 = vld [vmem:[#allocation7 + $0x60] ss:$16 sps:$4 sm:$0xff]   ;;  %v1689_v33 = vld [vmem:[#allocation7 + $0xcc] ss:$16 sps:$4 sm:$0xff]  }
  0x48   :  { %665 = vmatprep.subr.bf16.mxu1 %v1691_v16  ;;  %v103_v27 = vld [vmem:[#allocation2 + $0x8] sm:$0xff]  ;;  %v1687_v36 = vld [vmem:[#allocation7 + $0xc8] ss:$16 sps:$4 sm:$0xff]   ;;  %v1695_v37 = vld [vmem:[#allocation7 + $0xac] ss:$16 sps:$4 sm:$0xff]   ;;  %s1440_s20 = sshll.u32 %s2031_s19, 4  ;;  %s1441_s20 = int_to_ptr.vmem [resolvable:$true] %s1440_s20 }
  0x49   :  { %v1709_v30 = vld [vmem:[#allocation7 + $0x44] ss:$16 sps:$4 sm:$0xff]   ;;  %v104_v31 = vpack.c.bf16 %v103_v27, %v102_v26  ;;  %v1714_v34 = vld [vmem:[#allocation7 + $0x40] ss:$16 sps:$4 sm:$0xff]   ;;  %v1693_v40 = vld [vmem:[#allocation7 + $0xa8] ss:$16 sps:$4 sm:$0xff]   ;;  %p1996_p12 = scmp.lt.s32.totalorder %s1441_s20, %s1441_s20 }
  0x4a   :  { %213 = vmatpush1.bf16.msra.mxu0 %v1666_v8  ;;  %v1715_v35 = vld [vmem:[#allocation7 + $0x24] ss:$16 sps:$4 sm:$0xff]   ;;  %v1720_v38 = vld [vmem:[#allocation7 + $0x20] ss:$16 sps:$4 sm:$0xff]   ;;  %v1701_v41 = vld [vmem:[#allocation7 + $0x8c] ss:$16 sps:$4 sm:$0xff]  }
  0x4b   :  { %214 = vmatprep.subr.bf16.mxu0 %v1667_v9  ;;  %666 = vmatpush1.bf16.msra.mxu1 %v1696_v19  ;;  %v1721_v39 = vld [vmem:[#allocation7 + $0x4] ss:$16 sps:$4 sm:$0xff]   ;;  %v1726_v42 = vld [vmem:[#allocation7] ss:$16 sps:$4 sm:$0xff]   ;;  %v1699_v44 = vld [vmem:[#allocation7 + $0x88] ss:$16 sps:$4 sm:$0xff]  }
  0x4c   :  { %667 = vmatprep.subr.bf16.mxu1 %v1697_v20  ;;  %v1727_v43 = vld [vmem:[#allocation7 + $0x1e4] ss:$16 sps:$4 sm:$0xff]   ;;  %v1707_v45 = vld [vmem:[#allocation7 + $0x6c] ss:$16 sps:$4 sm:$0xff]   ;;  %v1732_v46 = vld [vmem:[#allocation7 + $0x1e0] ss:$16 sps:$4 sm:$0xff]  }
  0x4d   :  { %v1733_v47 = vld [vmem:[#allocation7 + $0x1c4] ss:$16 sps:$4 sm:$0xff]   ;;  %v1705_v48 = vld [vmem:[#allocation7 + $0x68] ss:$16 sps:$4 sm:$0xff]   ;;  %v1713_v49 = vld [vmem:[#allocation7 + $0x4c] ss:$16 sps:$4 sm:$0xff]  }
  0x4e   :  { %215 = vmatpush1.bf16.msra.mxu0 %v1669_v11  ;;  %v1738_v50 = vld [vmem:[#allocation7 + $0x1c0] ss:$16 sps:$4 sm:$0xff]   ;;  %v1739_v51 = vld [vmem:[#allocation7 + $0x1a4] ss:$16 sps:$4 sm:$0xff]   ;;  %v1711_v52 = vld [vmem:[#allocation7 + $0x48] ss:$16 sps:$4 sm:$0xff]  }
  0x4f   :  { %216 = vmatprep.subr.bf16.mxu0 %v1670_v14  ;;  %668 = vmatpush1.bf16.msra.mxu1 %v1702_v23  ;;  %v1719_v53 = vld [vmem:[#allocation7 + $0x2c] ss:$16 sps:$4 sm:$0xff]   ;;  %v1744_v54 = vld [vmem:[#allocation7 + $0x1a0] ss:$16 sps:$4 sm:$0xff]   ;;  %v1745_v55 = vld [vmem:[#allocation7 + $0x184] ss:$16 sps:$4 sm:$0xff]  }
  0x50   :  { %669 = vmatprep.subr.bf16.mxu1 %v1703_v24  ;;  %v1717_v56 = vld [vmem:[#allocation7 + $0x28] ss:$16 sps:$4 sm:$0xff]   ;;  %v1725_v57 = vld [vmem:[#allocation7 + $0xc] ss:$16 sps:$4 sm:$0xff]   ;;  %v1750_v58 = vld [vmem:[#allocation7 + $0x180] ss:$16 sps:$4 sm:$0xff]  }
  0x51   :  { %v1751_v59 = vld [vmem:[#allocation7 + $0x164] ss:$16 sps:$4 sm:$0xff]   ;;  %v1723_v60 = vld [vmem:[#allocation7 + $0x8] ss:$16 sps:$4 sm:$0xff]   ;;  %v1731_v61 = vld [vmem:[#allocation7 + $0x1ec] ss:$16 sps:$4 sm:$0xff]  }
  0x52   :  { %217 = vmatpush1.bf16.msra.mxu0 %v1672_v17  ;;  %v1756_v62 = vld [vmem:[#allocation7 + $0x160] ss:$16 sps:$4 sm:$0xff]   ;;  %v1729_v63 = vld [vmem:[#allocation7 + $0x1e8] ss:$16 sps:$4 sm:$0xff]   ;;  %v1737_v0 = vld [vmem:[#allocation7 + $0x1cc] ss:$16 sps:$4 sm:$0xff]  }
  0x53   :  { %218 = vmatprep.subr.bf16.mxu0 %v1673_v18  ;;  %670 = vmatpush1.bf16.msra.mxu1 %v1708_v29  ;;  %v1735_v1 = vld [vmem:[#allocation7 + $0x1c8] ss:$16 sps:$4 sm:$0xff]   ;;  %v1743_v2 = vld [vmem:[#allocation7 + $0x1ac] ss:$16 sps:$4 sm:$0xff]   ;;  %v1757_v8 = vld [vmem:[#allocation7 + $0x144] ss:$16 sps:$4 sm:$0xff]  }
  0x54   :  { %671 = vmatprep.subr.bf16.mxu1 %v1709_v30  ;;  %v1741_v3 = vld [vmem:[#allocation7 + $0x1a8] ss:$16 sps:$4 sm:$0xff]   ;;  %v1749_v4 = vld [vmem:[#allocation7 + $0x18c] ss:$16 sps:$4 sm:$0xff]   ;;  %v1762_v11 = vld [vmem:[#allocation7 + $0x140] ss:$16 sps:$4 sm:$0xff]  }
  0x55   :  { %v1747_v5 = vld [vmem:[#allocation7 + $0x188] ss:$16 sps:$4 sm:$0xff]   ;;  %v1755_v6 = vld [vmem:[#allocation7 + $0x16c] ss:$16 sps:$4 sm:$0xff]   ;;  %v1763_v12 = vld [vmem:[#allocation7 + $0x124] ss:$16 sps:$4 sm:$0xff]  }
  0x56   :  { %219 = vmatpush1.bf16.msra.mxu0 %v1675_v21  ;;  %v1753_v7 = vld [vmem:[#allocation7 + $0x168] ss:$16 sps:$4 sm:$0xff]   ;;  %v1761_v9 = vld [vmem:[#allocation7 + $0x14c] ss:$16 sps:$4 sm:$0xff]   ;;  %v1768_v15 = vld [vmem:[#allocation7 + $0x120] ss:$16 sps:$4 sm:$0xff]  }
  0x57   :  { %220 = vmatprep.subr.bf16.mxu0 %v1676_v22  ;;  %672 = vmatpush1.bf16.msra.mxu1 %v1714_v34  ;;  %v1759_v10 = vld [vmem:[#allocation7 + $0x148] ss:$16 sps:$4 sm:$0xff]   ;;  %v1767_v13 = vld [vmem:[#allocation7 + $0x12c] ss:$16 sps:$4 sm:$0xff]   ;;  %v1769_v16 = vld [vmem:[#allocation7 + $0x104] ss:$16 sps:$4 sm:$0xff]   ;;  %v120_v22 = vlaneseq }
  0x58   :  { %673 = vmatprep.subr.bf16.mxu1 %v1715_v35  ;;  %v1765_v14 = vld [vmem:[#allocation7 + $0x128] ss:$16 sps:$4 sm:$0xff]   ;;  %v1773_v17 = vld [vmem:[#allocation7 + $0x10c] ss:$16 sps:$4 sm:$0xff]   ;;  %v1774_v19 = vld [vmem:[#allocation7 + $0x100] ss:$16 sps:$4 sm:$0xff]  }
  0x59   :  { %v1771_v18 = vld [vmem:[#allocation7 + $0x108] ss:$16 sps:$4 sm:$0xff]   ;;  %v1777_v20 = vld [vmem:[#allocation8 + $0x74] ss:$8 sps:$4 sm:$0xff]   ;;  %v2100_v23 = vshrl.u32 %v120_v22, 7  ;;  %s1991_s21 = scalar_lea.vmem %s1441_s20, 128 }
  0x5a   :  { %221 = vmatpush1.bf16.msra.mxu0 %v1678_v25  ;;  %v1780_v21 = vld [vmem:[#allocation8 + $0x174] ss:$8 sps:$4 sm:$0xff]   ;;  %v118_v26 = vld [vmem:[%s2136_s2] sm:$0x3]  ;;  %v1846_v22 = vld [vmem:[#allocation8 + $0x1c4] ss:$8 sps:$4 sm:$0xff]   ;;  %p1992_p11 = scmp.ne.s32.totalorder %s1441_s20, %s1991_s21  ;;  %p1997_p13 = scmp.lt.s32.totalorder %s1991_s21, %s1991_s21 }
  0x5b   :  { %704 = vmatprep.subr.bf16.mxu0 %v1683_v28  ;;  %674 = vmatpush1.bf16.msra.mxu1 %v1720_v38  ;;  %v2103_v24 = vsub.s32 1, %v2100_v23  ;;  %v2106_v25 = vsub.s32 0, %v2100_v23 }
  0x5c   :  { %675 = vmatprep.subr.bf16.mxu1 %v1721_v39  ;;  %p1998_p0 = por %p1997_p13, %p1996_p12 }
  0x5d   :  { %1469 = vmatmul.mubr.msk.bf16.vlgmr.msra.gmra.mxu0 %vm195_vm1, %v104_v31  ;;  %v127_v28 = vrot.slane %v118_v26, %v2103_v24  ;;  %v123_v29 = vrot.slane %v118_v26, %v2106_v25  ;;  %v1841_v26 = vld [vmem:[#allocation8 + $0xc0] ss:$8 sps:$4 sm:$0xff]  }
  0x5e   :  { %705 = vmatpush1.bf16.msra.mxu0 %v1681_v32  ;;  %p1999_p1 = pnand %p1998_p0, %p1992_p11 }
  0x5f   :  { %706 = vmatprep.subr.bf16.mxu0 %v1689_v33  ;;  %676 = vmatpush1.bf16.msra.mxu1 %v1726_v42  ;;  %v1775_v42 = vld [vmem:[#allocation8 + $0x70] ss:$8 sps:$4 sm:$0xff]  }
  0x60   :  { %677 = vmatprep.subr.bf16.mxu1 %v1727_v43  ;;  %v1778_v43 = vld [vmem:[#allocation8 + $0x170] ss:$8 sps:$4 sm:$0xff]  }
  0x62   :  { %707 = vmatpush1.bf16.msra.mxu0 %v1687_v36 }
  0x63   :  { %708 = vmatprep.subr.bf16.mxu0 %v1695_v37  ;;  %678 = vmatpush2.bf16.msra.mxu1 %v1732_v46  ;;  %v1786_v46 = vld [vmem:[#allocation8 + $0x164] ss:$8 sps:$4 sm:$0xff]  }
  0x64   :  { %679 = vmatprep.subr.bf16.mxu1 %v1733_v47  ;;  %v1781_v47 = vld [vmem:[#allocation8 + $0x60] ss:$8 sps:$4 sm:$0xff]  }
  0x66   :  { %709 = vmatpush1.bf16.msra.mxu0 %v1693_v40 }
  0x67   :  { %710 = vmatprep.subr.bf16.mxu0 %v1701_v41  ;;  %680 = vmatpush2.bf16.msra.mxu1 %v1738_v50  ;;  %v1792_v50 = vld [vmem:[#allocation8 + $0x154] ss:$8 sps:$4 sm:$0xff]  }
  0x68   :  { %681 = vmatprep.subr.bf16.mxu1 %v1739_v51  ;;  %v1787_v51 = vld [vmem:[#allocation8 + $0x50] ss:$8 sps:$4 sm:$0xff]  }
  0x6a   :  { %711 = vmatpush1.bf16.msra.mxu0 %v1699_v44 }
  0x6b   :  { %712 = vmatprep.subr.bf16.mxu0 %v1707_v45  ;;  %682 = vmatpush2.bf16.msra.mxu1 %v1744_v54  ;;  %v1783_v45 = vld [vmem:[#allocation8 + $0x64] ss:$8 sps:$4 sm:$0xff]  }
  0x6c   :  { %683 = vmatprep.subr.bf16.mxu1 %v1745_v55  ;;  %v1798_v54 = vld [vmem:[#allocation8 + $0x144] ss:$8 sps:$4 sm:$0xff]   ;;  %v1793_v55 = vld [vmem:[#allocation8 + $0x40] ss:$8 sps:$4 sm:$0xff]  }
  0x6e   :  { %713 = vmatpush1.bf16.msra.mxu0 %v1705_v48  ;;  %v1784_v48 = vld [vmem:[#allocation8 + $0x160] ss:$8 sps:$4 sm:$0xff]  }
  0x6f   :  { %714 = vmatprep.subr.bf16.mxu0 %v1713_v49  ;;  %684 = vmatpush2.bf16.msra.mxu1 %v1750_v58  ;;  %v1789_v49 = vld [vmem:[#allocation8 + $0x54] ss:$8 sps:$4 sm:$0xff]  }
  0x70   :  { %685 = vmatprep.subr.bf16.mxu1 %v1751_v59  ;;  %v1804_v58 = vld [vmem:[#allocation8 + $0x134] ss:$8 sps:$4 sm:$0xff]   ;;  %v1799_v59 = vld [vmem:[#allocation8 + $0x30] ss:$8 sps:$4 sm:$0xff]  }
  0x72   :  { %715 = vmatpush1.bf16.msra.mxu0 %v1711_v52  ;;  %v1790_v52 = vld [vmem:[#allocation8 + $0x150] ss:$8 sps:$4 sm:$0xff]  }
  0x73   :  { %716 = vmatprep.subr.bf16.mxu0 %v1719_v53  ;;  %686 = vmatpush2.bf16.msra.mxu1 %v1756_v62  ;;  %v1795_v53 = vld [vmem:[#allocation8 + $0x44] ss:$8 sps:$4 sm:$0xff]  }
  0x74   :  { %687 = vmatprep.subr.bf16.mxu1 %v1757_v8  ;;  %v1810_v62 = vld [vmem:[#allocation8 + $0x124] ss:$8 sps:$4 sm:$0xff]   ;;  %v1820_v8 = vld [vmem:[#allocation8 + $0x100] ss:$8 sps:$4 sm:$0xff]  }
  0x76   :  { %717 = vmatpush1.bf16.msra.mxu0 %v1717_v56  ;;  %v1796_v56 = vld [vmem:[#allocation8 + $0x140] ss:$8 sps:$4 sm:$0xff]  }
  0x77   :  { %718 = vmatprep.subr.bf16.mxu0 %v1725_v57  ;;  %688 = vmatpush2.bf16.msra.mxu1 %v1762_v11  ;;  %v1801_v57 = vld [vmem:[#allocation8 + $0x34] ss:$8 sps:$4 sm:$0xff]   ;;  %v1823_v11 = vld [vmem:[#allocation8 + $0xf0] ss:$8 sps:$4 sm:$0xff]  }
  0x78   :  { %689 = vmatprep.subr.bf16.mxu1 %v1763_v12  ;;  %v1826_v12 = vld [vmem:[#allocation8 + $0x1f0] ss:$8 sps:$4 sm:$0xff]  }
  0x7a   :  { %719 = vmatpush1.bf16.msra.mxu0 %v1723_v60  ;;  %v1802_v60 = vld [vmem:[#allocation8 + $0x130] ss:$8 sps:$4 sm:$0xff]  }
  0x7b   :  { %720 = vmatprep.subr.bf16.mxu0 %v1731_v61  ;;  %690 = vmatpush2.bf16.msra.mxu1 %v1768_v15  ;;  %v1807_v61 = vld [vmem:[#allocation8 + $0x24] ss:$8 sps:$4 sm:$0xff]   ;;  %v1829_v15 = vld [vmem:[#allocation8 + $0xe0] ss:$8 sps:$4 sm:$0xff]  }
  0x7c   :  { %691 = vmatprep.subr.bf16.mxu1 %v1769_v16  ;;  %v1832_v16 = vld [vmem:[#allocation8 + $0x1e0] ss:$8 sps:$4 sm:$0xff]  }
  0x7e   :  { %721 = vmatpush2.bf16.msra.mxu0 %v1729_v63  ;;  %v1805_v63 = vld [vmem:[#allocation8 + $0x20] ss:$8 sps:$4 sm:$0xff]  }
  0x7f   :  { %722 = vmatprep.subr.bf16.mxu0 %v1737_v0  ;;  %692 = vmatpush2.bf16.msra.mxu1 %v1774_v19  ;;  %v1808_v0 = vld [vmem:[#allocation8 + $0x120] ss:$8 sps:$4 sm:$0xff]   ;;  %v1835_v19 = vld [vmem:[#allocation8 + $0xd0] ss:$8 sps:$4 sm:$0xff]  }
  0x80   :  { %1155 = vmatprep.subr.bf16.mxu1 %v1777_v20  ;;  %v1838_v20 = vld [vmem:[#allocation8 + $0x1d0] ss:$8 sps:$4 sm:$0xff]  }
  0x82   :  { %723 = vmatpush2.bf16.msra.mxu0 %v1735_v1  ;;  %v1813_v1 = vld [vmem:[#allocation8 + $0x14] ss:$8 sps:$4 sm:$0xff]  }
  0x83   :  { %724 = vmatprep.subr.bf16.mxu0 %v1743_v2  ;;  %v1816_v2 = vld [vmem:[#allocation8 + $0x114] ss:$8 sps:$4 sm:$0xff]  }
  0x86   :  { %725 = vmatpush2.bf16.msra.mxu0 %v1741_v3  ;;  %v1811_v3 = vld [vmem:[#allocation8 + $0x10] ss:$8 sps:$4 sm:$0xff]  }
  0x87   :  { %726 = vmatprep.subr.bf16.mxu0 %v1749_v4  ;;  %v1814_v4 = vld [vmem:[#allocation8 + $0x110] ss:$8 sps:$4 sm:$0xff]  }
  0x8a   :  { %727 = vmatpush2.bf16.msra.mxu0 %v1747_v5  ;;  %v1819_v5 = vld [vmem:[#allocation8 + $0x4] ss:$8 sps:$4 sm:$0xff]  }
  0x8b   :  { %728 = vmatprep.subr.bf16.mxu0 %v1755_v6  ;;  %v1822_v6 = vld [vmem:[#allocation8 + $0x104] ss:$8 sps:$4 sm:$0xff]  }
  0x8e   :  { %729 = vmatpush2.bf16.msra.mxu0 %v1753_v7  ;;  %v1817_v7 = vld [vmem:[#allocation8] ss:$8 sps:$4 sm:$0xff]  }
  0x8f   :  { %730 = vmatprep.subr.bf16.mxu0 %v1761_v9  ;;  %v1825_v9 = vld [vmem:[#allocation8 + $0xf4] ss:$8 sps:$4 sm:$0xff]  }
  0x92   :  { %731 = vmatpush2.bf16.msra.mxu0 %v1759_v10  ;;  %v1828_v10 = vld [vmem:[#allocation8 + $0x1f4] ss:$8 sps:$4 sm:$0xff]  }
  0x93   :  { %732 = vmatprep.subr.bf16.mxu0 %v1767_v13  ;;  %v1831_v13 = vld [vmem:[#allocation8 + $0xe4] ss:$8 sps:$4 sm:$0xff]  }
  0x96   :  { %733 = vmatpush2.bf16.msra.mxu0 %v1765_v14  ;;  %v1834_v14 = vld [vmem:[#allocation8 + $0x1e4] ss:$8 sps:$4 sm:$0xff]  }
  0x97   :  { %734 = vmatprep.subr.bf16.mxu0 %v1773_v17  ;;  %v1837_v17 = vld [vmem:[#allocation8 + $0xd4] ss:$8 sps:$4 sm:$0xff]  }
  0x9a   :  { %735 = vmatpush2.bf16.msra.mxu0 %v1771_v18  ;;  %v1840_v18 = vld [vmem:[#allocation8 + $0x1d4] ss:$8 sps:$4 sm:$0xff]  }
  0x9b   :  { %1198 = vmatprep.subr.bf16.mxu0 %v1780_v21  ;;  %v1843_v21 = vld [vmem:[#allocation8 + $0xc4] ss:$8 sps:$4 sm:$0xff]  }
 0x11d   :  { %v240_v27 = vpop.f32.mrf.mxu0 }
 0x11e   :  { %v241_v34 = vadd.f32 %v240_v27, %v123_v29  ;;  %v1844_v27 = vld [vmem:[#allocation8 + $0x1c0] ss:$8 sps:$4 sm:$0xff]  }
 0x11f   :  { %v242_v30 = vpop.f32.mrf.mxu0 }
 0x120   :  { %v243_v32 = vadd.f32 %v242_v30, %v127_v28  ;;  %v249_v40 = vmax.f32 %v241_v34, 0.0  ;;  %v1847_v30 = vld [vmem:[#allocation8 + $0xb0] ss:$8 sps:$4 sm:$0xff]   ;;  %v1853_v34 = vld [vmem:[#allocation8 + $0xa0] ss:$8 sps:$4 sm:$0xff]  }
 0x121   :  { %v244_v31 = vpop.f32.mrf.mxu0 }
 0x122   :  { %v245_v33 = vadd.f32 %v244_v31, %v123_v29  ;;  %v250_v38 = vmax.f32 %v243_v32, 0.0  ;;  %v1852_v29 = vld [vmem:[#allocation8 + $0x1b4] ss:$8 sps:$4 sm:$0xff]   ;;  %v1850_v31 = vld [vmem:[#allocation8 + $0x1b0] ss:$8 sps:$4 sm:$0xff]  }
 0x123   :  { %v246_v35 = vpop.f32.mrf.mxu0  ;;  %v1855_v32 = vld [vmem:[#allocation8 + $0xa4] ss:$8 sps:$4 sm:$0xff]  }
 0x124   :  { %v247_v36 = vadd.f32 %v246_v35, %v127_v28  ;;  %v251_v37 = vmax.f32 %v245_v33, 0.0  ;;  %v1849_v28 = vld [vmem:[#allocation8 + $0xb4] ss:$8 sps:$4 sm:$0xff]   ;;  %v1858_v33 = vld [vmem:[#allocation8 + $0x1a4] ss:$8 sps:$4 sm:$0xff]  }
 0x125   :  { %v1856_v35 = vld [vmem:[#allocation8 + $0x1a0] ss:$8 sps:$4 sm:$0xff]  }
 0x126   :  { %v252_v39 = vmax.f32 %v247_v36, 0.0  ;;  %v253_v44 = vpack.c.bf16 %v251_v37, %v249_v40  ;;  %v1861_v36 = vld [vmem:[#allocation8 + $0x94] ss:$8 sps:$4 sm:$0xff]   ;;  %v1867_v40 = vld [vmem:[#allocation8 + $0x84] ss:$8 sps:$4 sm:$0xff]  }
 0x127   :  { %v1864_v37 = vld [vmem:[#allocation8 + $0x194] ss:$8 sps:$4 sm:$0xff]  }
 0x128   :  { %v254_v41 = vpack.c.bf16 %v252_v39, %v250_v38  ;;  %v1859_v38 = vld [vmem:[#allocation8 + $0x90] ss:$8 sps:$4 sm:$0xff]  }
 0x129   :  { %v1862_v39 = vld [vmem:[#allocation8 + $0x190] ss:$8 sps:$4 sm:$0xff]  }
 0x12a   :  { %693 = vmatprep.mubr.bf16.mxu1 %v254_v41  ;;  %736 = vmatprep.mubr.bf16.mxu0 %v254_v41  ;;  %v1870_v41 = vld [vmem:[#allocation8 + $0x184] ss:$8 sps:$4 sm:$0xff]  }
 0x12b   :  { %694 = vmatmul.mubr.bf16.vlgmr.msra.gmra.mxu1 %v253_v44  ;;  %737 = vmatmul.mubr.bf16.vlgmr.msra.gmra.mxu0 %v253_v44  ;;  %v1871_v44 = vld [vmem:[#allocation10 + $0x78] sm:$0xff]  }
 0x12c   :  { %1156 = vmatpush1.bf16.msra.mxu1 %v1775_v42  ;;  %1199 = vmatpush1.bf16.msra.mxu0 %v1778_v43  ;;  %v1865_v42 = vld [vmem:[#allocation8 + $0x80] ss:$8 sps:$4 sm:$0xff]  }
 0x12d   :  { %1157 = vmatprep.subr.bf16.mxu1 %v1783_v45  ;;  %1200 = vmatprep.subr.bf16.mxu0 %v1786_v46  ;;  %v1868_v43 = vld [vmem:[#allocation8 + $0x180] ss:$8 sps:$4 sm:$0xff]   ;;  %v335_v45 = vsub.s32 3, %v2100_v23  ;;  %v331_v46 = vsub.s32 2, %v2100_v23 }
 0x130   :  { %1158 = vmatpush1.bf16.msra.mxu1 %v1781_v47  ;;  %1201 = vmatpush1.bf16.msra.mxu0 %v1784_v48  ;;  %v319_v47 = vld [vmem:[%s2138_s4] sm:$0xf] }
 0x131   :  { %1159 = vmatprep.subr.bf16.mxu1 %v1789_v49  ;;  %1202 = vmatprep.subr.bf16.mxu0 %v1792_v50  ;;  %v328_v50 = vrot.slane %v319_v47, %v2103_v24 }
 0x134   :  { %1160 = vmatpush1.bf16.msra.mxu1 %v1787_v51  ;;  %1203 = vmatpush1.bf16.msra.mxu0 %v1790_v52  ;;  %v336_v51 = vrot.slane %v319_v47, %v335_v45  ;;  %v324_v52 = vrot.slane %v319_v47, %v2106_v25 }
 0x135   :  { %1161 = vmatprep.subr.bf16.mxu1 %v1795_v53  ;;  %1204 = vmatprep.subr.bf16.mxu0 %v1798_v54  ;;  %v332_v53 = vrot.slane %v319_v47, %v331_v46 }
 0x138   :  { %1162 = vmatpush1.bf16.msra.mxu1 %v1793_v55  ;;  %1205 = vmatpush1.bf16.msra.mxu0 %v1796_v56 }
 0x139   :  { %1163 = vmatprep.subr.bf16.mxu1 %v1801_v57  ;;  %1206 = vmatprep.subr.bf16.mxu0 %v1804_v58 }
 0x13c   :  { %1164 = vmatpush1.bf16.msra.mxu1 %v1799_v59  ;;  %1207 = vmatpush1.bf16.msra.mxu0 %v1802_v60 }
 0x13d   :  { %1165 = vmatprep.subr.bf16.mxu1 %v1807_v61  ;;  %1208 = vmatprep.subr.bf16.mxu0 %v1810_v62 }
 0x140   :  { %1166 = vmatpush1.bf16.msra.mxu1 %v1805_v63  ;;  %1209 = vmatpush1.bf16.msra.mxu0 %v1808_v0 }
 0x141   :  { %1167 = vmatprep.subr.bf16.mxu1 %v1813_v1  ;;  %1210 = vmatprep.subr.bf16.mxu0 %v1816_v2 }
 0x144   :  { %1168 = vmatpush1.bf16.msra.mxu1 %v1811_v3  ;;  %1211 = vmatpush1.bf16.msra.mxu0 %v1814_v4 }
 0x145   :  { %1169 = vmatprep.subr.bf16.mxu1 %v1819_v5  ;;  %1212 = vmatprep.subr.bf16.mxu0 %v1822_v6 }
 0x148   :  { %1170 = vmatpush1.bf16.msra.mxu1 %v1817_v7  ;;  %1213 = vmatpush1.bf16.msra.mxu0 %v1820_v8 }
 0x149   :  { %1171 = vmatprep.subr.bf16.mxu1 %v1825_v9  ;;  %1214 = vmatprep.subr.bf16.mxu0 %v1828_v10 }
 0x14c   :  { %1172 = vmatpush2.bf16.msra.mxu1 %v1823_v11  ;;  %1215 = vmatpush2.bf16.msra.mxu0 %v1826_v12 }
 0x14d   :  { %1173 = vmatprep.subr.bf16.mxu1 %v1831_v13  ;;  %1216 = vmatprep.subr.bf16.mxu0 %v1834_v14  ;;  %v1872_v13 = vld [vmem:[#allocation10 + $0x38] sm:$0xff]  }
 0x150   :  { %1174 = vmatpush2.bf16.msra.mxu1 %v1829_v15  ;;  %1217 = vmatpush2.bf16.msra.mxu0 %v1832_v16  ;;  %v1873_v16 = vld [vmem:[#allocation10 + $0x70] sm:$0xff]  }
 0x151   :  { %1175 = vmatprep.subr.bf16.mxu1 %v1837_v17  ;;  %1218 = vmatprep.subr.bf16.mxu0 %v1840_v18  ;;  %v1874_v17 = vld [vmem:[#allocation10 + $0x30] sm:$0xff]   ;;  %v1875_v18 = vld [vmem:[#allocation10 + $0x68] sm:$0xff]  }
 0x154   :  { %1176 = vmatpush2.bf16.msra.mxu1 %v1835_v19  ;;  %1219 = vmatpush2.bf16.msra.mxu0 %v1838_v20  ;;  %v1876_v19 = vld [vmem:[#allocation10 + $0x28] sm:$0xff]   ;;  %v1877_v20 = vld [vmem:[#allocation10 + $0x60] sm:$0xff]  }
 0x155   :  { %1177 = vmatprep.subr.bf16.mxu1 %v1843_v21  ;;  %1220 = vmatprep.subr.bf16.mxu0 %v1846_v22  ;;  %v1878_v21 = vld [vmem:[#allocation10 + $0x20] sm:$0xff]   ;;  %v1879_v22 = vld [vmem:[#allocation10 + $0x58] sm:$0xff]  }
 0x158   :  { %1178 = vmatpush2.bf16.msra.mxu1 %v1841_v26  ;;  %1221 = vmatpush2.bf16.msra.mxu0 %v1844_v27  ;;  %v1880_v26 = vld [vmem:[#allocation10 + $0x18] sm:$0xff]   ;;  %v1881_v27 = vld [vmem:[#allocation10 + $0x50] sm:$0xff]  }
 0x159   :  { %1179 = vmatprep.subr.bf16.mxu1 %v1849_v28  ;;  %1222 = vmatprep.subr.bf16.mxu0 %v1852_v29  ;;  %v1882_v28 = vld [vmem:[#allocation10 + $0x10] sm:$0xff]   ;;  %v1883_v29 = vld [vmem:[#allocation10 + $0x48] sm:$0xff]  }
 0x15c   :  { %1180 = vmatpush2.bf16.msra.mxu1 %v1847_v30  ;;  %1223 = vmatpush2.bf16.msra.mxu0 %v1850_v31  ;;  %v1884_v30 = vld [vmem:[#allocation10 + $0x8] sm:$0xff]   ;;  %v1885_v31 = vld [vmem:[#allocation10 + $0x40] sm:$0xff]  }
 0x15d   :  { %1181 = vmatprep.subr.bf16.mxu1 %v1855_v32  ;;  %1224 = vmatprep.subr.bf16.mxu0 %v1858_v33  ;;  %v1886_v32 = vld [vmem:[#allocation10] sm:$0xff]   ;;  %v823_v33 = vld [vmem:[%s2140_s6] sm:$0x3] }
 0x160   :  { %1182 = vmatpush2.bf16.msra.mxu1 %v1853_v34  ;;  %1225 = vmatpush2.bf16.msra.mxu0 %v1856_v35  ;;  %v832_v34 = vrot.slane %v823_v33, %v2103_v24  ;;  %v828_v35 = vrot.slane %v823_v33, %v2106_v25 }
 0x161   :  { %1183 = vmatprep.subr.bf16.mxu1 %v1861_v36  ;;  %1226 = vmatprep.subr.bf16.mxu0 %v1864_v37 }
 0x164   :  { %1184 = vmatpush2.bf16.msra.mxu1 %v1859_v38  ;;  %1227 = vmatpush2.bf16.msra.mxu0 %v1862_v39 }
 0x165   :  { %1185 = vmatprep.subr.bf16.mxu1 %v1867_v40  ;;  %1228 = vmatprep.subr.bf16.mxu0 %v1870_v41 }
 0x168   :  { %1186 = vmatpush2.bf16.msra.mxu1 %v1865_v42  ;;  %1229 = vmatpush2.bf16.msra.mxu0 %v1868_v43 }
 0x169   :  { %1624 = vmatprep.subr.bf16.mxu1 %v1871_v44 }
 0x1eb   :  { %v695_v48 = vpop.f32.mrf.mxu1  ;;  %v738_v49 = vpop.f32.mrf.mxu0 }
 0x1ec   :  { %v696_v61 = vadd.f32 %v695_v48, %v324_v52  ;;  %v739_v62 = vadd.f32 %v738_v49, %v332_v53 }
 0x1ed   :  { %v697_v54 = vpop.f32.mrf.mxu1  ;;  %v740_v55 = vpop.f32.mrf.mxu0 }
 0x1ee   :  { %v698_v58 = vadd.f32 %v697_v54, %v328_v50  ;;  %v741_v59 = vadd.f32 %v740_v55, %v336_v51  ;;  %v747_v9 = vmax.f32 %v696_v61, 0.0  ;;  %v749_v10 = vmax.f32 %v739_v62, 0.0 }
 0x1ef   :  { %v699_v56 = vpop.f32.mrf.mxu1  ;;  %v742_v57 = vpop.f32.mrf.mxu0 }
 0x1f0   :  { %v700_v60 = vadd.f32 %v699_v56, %v324_v52  ;;  %v743_v23 = vadd.f32 %v742_v57, %v332_v53  ;;  %v748_v5 = vmax.f32 %v698_v58, 0.0  ;;  %v750_v6 = vmax.f32 %v741_v59, 0.0  ;;  %v1598_v58 = vld [vmem:[%s2142_s8] ss:$0 sm:$0xff] }
 0x1f1   :  { %v701_v63 = vpop.f32.mrf.mxu1  ;;  %v744_v0 = vpop.f32.mrf.mxu0 }
 0x1f2   :  { %v702_v1 = vadd.f32 %v701_v63, %v328_v50  ;;  %v745_v2 = vadd.f32 %v744_v0, %v336_v51  ;;  %v751_v3 = vmax.f32 %v700_v60, 0.0  ;;  %v753_v4 = vmax.f32 %v743_v23, 0.0 }
 0x1f4   :  { %v752_v7 = vmax.f32 %v702_v1, 0.0  ;;  %v754_v8 = vmax.f32 %v745_v2, 0.0  ;;  %v755_v14 = vpack.c.bf16 %v751_v3, %v747_v9  ;;  %v757_v15 = vpack.c.bf16 %v753_v4, %v749_v10 }
 0x1f6   :  { %v756_v11 = vpack.c.bf16 %v752_v7, %v748_v5  ;;  %v758_v12 = vpack.c.bf16 %v754_v8, %v750_v6 }
 0x1f8   :  { %1187 = vmatprep.mubr.bf16.mxu1 %v756_v11  ;;  %1230 = vmatprep.mubr.bf16.mxu0 %v758_v12 }
 0x1f9   :  { %1188 = vmatmul.mubr.bf16.vlgmr.msra.gmra.mxu1 %v755_v14  ;;  %1231 = vmatmul.mubr.bf16.vlgmr.msra.gmra.mxu0 %v757_v15 }
 0x1fa   :  { %1625 = vmatpush3.bf16.msra.mxu1 %v1872_v13 }
 0x1fb   :  { %1626 = vmatprep.subr.bf16.mxu1 %v1873_v16 }
 0x1fe   :  { %1627 = vmatpush3.bf16.msra.mxu1 %v1874_v17 }
 0x1ff   :  { %1628 = vmatprep.subr.bf16.mxu1 %v1875_v18 }
 0x202   :  { %1629 = vmatpush3.bf16.msra.mxu1 %v1876_v19 }
 0x203   :  { %1630 = vmatprep.subr.bf16.mxu1 %v1877_v20 }
 0x206   :  { %1631 = vmatpush3.bf16.msra.mxu1 %v1878_v21 }
 0x207   :  { %1632 = vmatprep.subr.bf16.mxu1 %v1879_v22 }
 0x20a   :  { %1633 = vmatpush3.bf16.msra.mxu1 %v1880_v26 }
 0x20b   :  { %1634 = vmatprep.subr.bf16.mxu1 %v1881_v27 }
 0x20e   :  { %1635 = vmatpush3.bf16.msra.mxu1 %v1882_v28 }
 0x20f   :  { %1636 = vmatprep.subr.bf16.mxu1 %v1883_v29 }
 0x212   :  { %1637 = vmatpush3.bf16.msra.mxu1 %v1884_v30 }
 0x213   :  { %1638 = vmatprep.subr.bf16.mxu1 %v1885_v31 }
 0x216   :  { %1639 = vmatpush3.bf16.msra.mxu1 %v1886_v32 }
 0x2b9   :  { %v1189_v36 = vpop.f32.mrf.mxu1  ;;  %v1232_v37 = vpop.f32.mrf.mxu0 }
 0x2ba   :  { %v1190_v41 = vadd.f32 %v1189_v36, %v828_v35 }
 0x2bb   :  { %v1191_v38 = vpop.f32.mrf.mxu1  ;;  %v1234_v39 = vpop.f32.mrf.mxu0 }
 0x2bc   :  { %v1192_v40 = vadd.f32 %v1191_v38, %v832_v34  ;;  %v1233_v49 = vadd.f32 %v1232_v37, %v1190_v41 }
 0x2bd   :  { %v1193_v42 = vpop.f32.mrf.mxu1  ;;  %v1236_v43 = vpop.f32.mrf.mxu0 }
 0x2be   :  { %v1194_v44 = vadd.f32 %v1193_v42, %v828_v35  ;;  %v1235_v46 = vadd.f32 %v1234_v39, %v1192_v40  ;;  %v1241_v25 = vmax.f32 %v1233_v49, 0.0 }
 0x2bf   :  { %v1195_v45 = vpop.f32.mrf.mxu1  ;;  %v1238_v50 = vpop.f32.mrf.mxu0 }
 0x2c0   :  { %v1237_v47 = vadd.f32 %v1236_v43, %v1194_v44  ;;  %v1196_v48 = vadd.f32 %v1195_v45, %v832_v34  ;;  %v1242_v24 = vmax.f32 %v1235_v46, 0.0 }
 0x2c2   :  { %v1239_v51 = vadd.f32 %v1238_v50, %v1196_v48  ;;  %v1243_v52 = vmax.f32 %v1237_v47, 0.0 }
 0x2c4   :  { %v1244_v53 = vmax.f32 %v1239_v51, 0.0  ;;  %v1245_v55 = vpack.c.bf16 %v1243_v52, %v1241_v25 }
 0x2c6   :  { %v1246_v54 = vpack.c.bf16 %v1244_v53, %v1242_v24 }
 0x2c8   :  { %1414 = vmatprep.mubr.bf16.mxu1 %v1246_v54 }
 0x2c9   :  { %1415 = vmatmul.mubr.bf16.vlgmr.msra.gmra.mxu1 %v1245_v55 }
 0x389   :  { %v1640_v56 = vpop.f32.mrf.mxu1 }
 0x38b   :  { %v1641_v57 = vpop.f32.mrf.mxu1 }
 0x38c   :  { %v1642_v59 = vadd.f32 %v1641_v57, %v1640_v56 }
 0x38d   :  { %v1643_v60 = vpop.f32.mrf.mxu1 }
 0x38e   :  { %v1417_v23 = vadd.f32 %v1642_v59, %v1598_v58 }
 0x38f   :  { %v1644_v61 = vpop.f32.mrf.mxu1 }
 0x390   :  { %v1645_v62 = vadd.f32 %v1644_v61, %v1643_v60  ;;  %1887 = vtanh.f32 %v1417_v23 }
 0x392   :  { %v1420_v63 = vadd.f32 %v1645_v62, %v1598_v58 }
 0x394   :  { %1889 = vtanh.f32 %v1420_v63 }
 0x39d   :  { %v1888_v0 = vpop.eup %1887 }
 0x3a1   :  { %v1890_v1 = vpop.eup %1889 }
 0x3a2   :  { %v1622_v2 = vpack.c.bf16 %v1890_v1, %v1888_v0 }
 0x3a4   :  { %1623 = vst [vmem:[#allocation11] sm:$0xff] %v1622_v2  }
 0x3a5   :  { %2002 = shalt.err (!%p1999_p1)
}
 0x3a6   :  { %1446 = dma.vmem_to_hbm [thread:$0]  %s1441_s20, 128, %s2143_s9, [#allocation4], %s2028_s0, %s2028_s0, %s2029_s13  }
 0x3a7   :  { %2017 = dma.done.wait [#allocation4], 128  }
 0x3a8   :  { %2018 = vsyncadd [#allocation4], 4294967168 }
 0x3a9   :  { %1450 = vsyncpa [#allocation3], 1 }
 0x3aa   :  { %1451 = vsyncpa [#allocation6], 1 }
 0x3ab   :  { %1452 = vsyncpa [#allocation9], 1 }
 0x3ac   :  { %1453 = vsyncpa [#allocation4], 1 }

</bundles_post_ra>
